<compile_context>
chip_gen: v5e
topology: v5e:2x2
jax: 0.10.0
libtpu: 0.0.40
codegen_flags: <defaults>
</compile_context>

<pallas_src>
import functools

import jax
import jax.numpy as jnp
from jax.experimental import pallas as pl
from jax.experimental.pallas import tpu as pltpu


def _lddt_kernel(x_ref, w_ref, b_ref, o_ref):
    # x_ref : (1, TL, n_feat)   current (batch, seq-tile)
    # w_ref : (n_bin, n_feat)   weight (original PyTorch layout, resident)
    # b_ref : (n_bin, 1)        bias (resident)
    # o_ref : (1, n_bin, TL)    permuted logits for this (batch, seq-tile)
    x = x_ref[0]                                   # (TL, n_feat)
    w = w_ref[...]                                 # (n_bin, n_feat)
    # (n_bin, n_feat) · (TL, n_feat)^T -> (n_bin, TL): contraction on last dims,
    # MXU handles the transposed contraction natively; f32 accumulation.
    logits = jax.lax.dot_general(
        w, x,
        dimension_numbers=(((1,), (1,)), ((), ())),
        preferred_element_type=jnp.float32,
    )                                              # (n_bin, TL) f32
    logits = logits + b_ref[...]                   # broadcast bias over L (f32)
    o_ref[0] = logits.astype(o_ref.dtype)          # already permuted; cast at store


def _round_up(v, m):
    return ((v + m - 1) // m) * m


@functools.partial(jax.jit, static_argnames=())
def lddt_network_forward(x, weight, bias):
    """x: (B, L, n_feat); weight: (n_bin, n_feat); bias: (n_bin,)
    returns (B, n_bin, L), matching LDDTNetwork.forward (Linear + permute)."""
    B, L, n_feat = x.shape
    n_bin = weight.shape[0]

    # Sequence tile: multiple of 128 (lane-dense output stores), capped at 512.
    TL = min(512, _round_up(L, 128))
    L_pad = _round_up(L, TL)
    if L_pad != L:
        x = jnp.pad(x, ((0, 0), (0, L_pad - L), (0, 0)))

    b2 = bias.reshape(n_bin, 1).astype(jnp.float32)   # (n_bin, 1), f32 epilogue

    out_dtype = x.dtype
    cost = pl.CostEstimate(
        flops=2 * B * L_pad * n_feat * n_bin,
        transcendentals=0,
        bytes_accessed=(x.size * x.dtype.itemsize
                        + weight.size * weight.dtype.itemsize
                        + B * n_bin * L_pad * jnp.dtype(out_dtype).itemsize),
    )

    out_padded = pl.pallas_call(
        _lddt_kernel,
        out_shape=jax.ShapeDtypeStruct((B, n_bin, L_pad), out_dtype),
        grid_spec=pltpu.PrefetchScalarGridSpec(
            num_scalar_prefetch=0,
            grid=(B, L_pad // TL),
            in_specs=[
                pl.BlockSpec((1, TL, n_feat), lambda b, l: (b, l, 0)),
                pl.BlockSpec((n_bin, n_feat), lambda b, l: (0, 0)),   # resident
                pl.BlockSpec((n_bin, 1), lambda b, l: (0, 0)),        # resident
            ],
            out_specs=pl.BlockSpec((1, n_bin, TL), lambda b, l: (b, 0, l)),
        ),
        compiler_params=pltpu.CompilerParams(
            dimension_semantics=("parallel", "parallel")),
        cost_estimate=cost,
    )(x, weight, b2)

    # Drop the padded tail (padded rows only contained the broadcast bias).
    return out_padded[:, :, :L]


def make_lddt_params(n_feat, n_bin_lddt=50, dtype=jnp.float32):
    # reset_parameter(): weight and bias are zero-initialized (deterministic).
    weight = jnp.zeros((n_bin_lddt, n_feat), dtype=dtype)
    bias = jnp.zeros((n_bin_lddt,), dtype=dtype)
    return weight, bias


if __name__ == "__main__":
    key = jax.random.PRNGKey(0)
    kx, kw, kb = jax.random.split(key, 3)

    B, L, n_feat, n_bin = 2, 8, 32, 50
    x = jax.random.normal(kx, (B, L, n_feat), dtype=jnp.float32)

    # Non-trivial params to exercise the kernel (module default is zeros,
    # available via make_lddt_params).
    weight = 0.1 * jax.random.normal(kw, (n_bin, n_feat), dtype=jnp.float32)
    bias = 0.1 * jax.random.normal(kb, (n_bin,), dtype=jnp.float32)

    out = lddt_network_forward(x, weight, bias)
    out = jax.block_until_ready(out)

    # Reference check (plain JAX): Linear then permute(0, 2, 1)
    ref = jnp.transpose(jnp.einsum("blf,nf->bln", x, weight) + bias, (0, 2, 1))
    assert out.shape == (B, n_bin, L), out.shape
    assert jnp.allclose(out, ref, atol=1e-5), "mismatch vs reference"

    # Also verify the module's default (zero-init) parameters.
    w0, b0 = make_lddt_params(n_feat, n_bin)
    out0 = jax.block_until_ready(lddt_network_forward(x, w0, b0))
    assert jnp.allclose(out0, jnp.zeros((B, n_bin, L), jnp.float32)), "zero-init mismatch"

    print("KERNEL_OK")
</pallas_src>

<mosaic_0001>
module attributes {stable_mosaic.version = 11 : i64} {
  func.func @_lddt_kernel(%arg0: i32, %arg1: i32, %arg2: memref<1x128x32xf32, #tpu.memory_space<vmem>>, %arg3: memref<50x32xf32, #tpu.memory_space<vmem>>, %arg4: memref<50x1xf32, #tpu.memory_space<vmem>>, %arg5: memref<1x50x128xf32, #tpu.memory_space<vmem>>) attributes {dimension_semantics = [#tpu.dimension_semantics<parallel>, #tpu.dimension_semantics<parallel>], iteration_bounds = array<i64: 2, 1>, scalar_prefetch = 0 : i64, scratch_operands = 0 : i64, tpu.core_type = #tpu.core_type<tc>, window_params = [{transform_indices = @transform_0, window_bounds = array<i64: 1, 128, 32>}, {pipeline_mode = #tpu.pipeline_mode<synchronous>, transform_indices = @transform_1, window_bounds = array<i64: 50, 32>}, {pipeline_mode = #tpu.pipeline_mode<synchronous>, transform_indices = @transform_2, window_bounds = array<i64: 50, 1>}, {transform_indices = @transform_3, window_bounds = array<i64: 1, 50, 128>}]} {
    %c0 = arith.constant 0 : index
    %c0_0 = arith.constant 0 : index
    %c0_1 = arith.constant 0 : index
    %0 = vector.load %arg2[%c0, %c0_0, %c0_1] : memref<1x128x32xf32, #tpu.memory_space<vmem>>, vector<1x128x32xf32>
    %1 = vector.shape_cast %0 : vector<1x128x32xf32> to vector<128x32xf32>
    %c0_2 = arith.constant 0 : index
    %c0_3 = arith.constant 0 : index
    %2 = vector.load %arg3[%c0_2, %c0_3] : memref<50x32xf32, #tpu.memory_space<vmem>>, vector<50x32xf32>
    %cst = arith.constant dense<0.000000e+00> : vector<50x128xf32>
    %3 = tpu.matmul %2, %1, %cst {dimension_numbers = #tpu.dot_dimension_numbers<[1], [1], [0], [0], [0, 0, 1, 0], [], []>} : vector<50x32xf32>, vector<128x32xf32>, vector<50x128xf32> -> vector<50x128xf32>
    %c0_4 = arith.constant 0 : index
    %c0_5 = arith.constant 0 : index
    %4 = vector.load %arg4[%c0_4, %c0_5] : memref<50x1xf32, #tpu.memory_space<vmem>>, vector<50x1xf32>
    %5 = vector.broadcast %4 : vector<50x1xf32> to vector<50x128xf32>
    %6 = arith.addf %3, %5 : vector<50x128xf32>
    %c0_6 = arith.constant 0 : index
    %c0_7 = arith.constant 0 : index
    %c0_8 = arith.constant 0 : index
    %7 = vector.load %arg5[%c0_6, %c0_7, %c0_8] : memref<1x50x128xf32, #tpu.memory_space<vmem>>, vector<1x50x128xf32>
    %8 = vector.shape_cast %7 : vector<1x50x128xf32> to vector<50x128xf32>
    %9 = vector.shape_cast %6 : vector<50x128xf32> to vector<1x50x128xf32>
    tpu.vector_store %arg5[%c0_6, %c0_7, %c0_8], %9 {strides = array<i32>} : memref<1x50x128xf32, #tpu.memory_space<vmem>>, vector<1x50x128xf32>,
    return
  }
  func.func @transform_0(%arg0: i32, %arg1: i32) -> (i32, i32, i32) {
    %c0_i32 = arith.constant 0 : i32
    %c0_i32_0 = arith.constant 0 : i32
    return %arg0, %arg1, %c0_i32 : i32, i32, i32
  }
  func.func @transform_1(%arg0: i32, %arg1: i32) -> (i32, i32) {
    %c0_i32 = arith.constant 0 : i32
    %c0_i32_0 = arith.constant 0 : i32
    %c0_i32_1 = arith.constant 0 : i32
    return %c0_i32, %c0_i32_0 : i32, i32
  }
  func.func @transform_2(%arg0: i32, %arg1: i32) -> (i32, i32) {
    %c0_i32 = arith.constant 0 : i32
    %c0_i32_0 = arith.constant 0 : i32
    %c0_i32_1 = arith.constant 0 : i32
    return %c0_i32, %c0_i32_0 : i32, i32
  }
  func.func @transform_3(%arg0: i32, %arg1: i32) -> (i32, i32, i32) {
    %c0_i32 = arith.constant 0 : i32
    %c0_i32_0 = arith.constant 0 : i32
    return %arg0, %c0_i32, %arg1 : i32, i32, i32
  }
}

</mosaic_0001>

<bundles_post_ra>
// kernel: lddt_network_forward.1
= control target key start
LH: loop header
LB: loop body
LE: loop exit
PB: predicated region body
PF: predicated region fallthrough
CT: control target
= control target key end

     0   :  { %s626_s12 = smov 0   ;;  %s628_s13 = smov 0   ;;  %s794_s0 = inlined_call_operand.vmem [shape: f32[2,128,32], index: 0, kind: input, shape index: {}]   ;;  %s795_s1 = inlined_call_operand.vmem [shape: f32[50,32], index: 1, kind: input, shape index: {}]   ;;  %s796_s2 = inlined_call_operand.vmem [shape: f32[50,1], index: 2, kind: input, shape index: {}]   ;;  %s797_s3 = inlined_call_operand.vmem [shape: f32[2,50,128], index: 3, kind: output, shape index: {}]  }
   0x1   :  { %s630_s14 = smov 0  }
   0x2 LB: > { %s25_s15 = sadd.s32 1, %s599_s13  ;;  %p474_p0 = scmp.ge.s32.totalorder %s603_s14, 1  ;;  %s603_s14 = sphi %s630_s14, %s13_s14   ;;  %s599_s13 = sphi %s628_s13, %s799_s13   ;;  %s595_s12 = sphi %s626_s12, %s798_s12  }
   0x3   : > { %p27_p1 = scmp.ge.s32.totalorder %s25_s15, 2  ;;  %p158_p2 = scmp.lt.s32.totalorder %s603_s14, 3 }
   0x5   : > { %s801_s15 = smov (%p27_p1, %s25_s15), 0  ;;  %p159_p3 = pnand %p474_p0, %p158_p2 }
   0x6   : > { %p190_p4 = scmp.lt.s32.totalorder (!%p159_p3), %s595_s12, 1 }
   0x7   : > { %162 = sbr.rel (%p159_p3) target bundleno = 223 (0xdf), region = 32 }
   0xc   : > { %s803_s12 = smov (!%p190_p4, %s595_s12), 1  ;;  %vm272_vm0 = vcmask 261120   ;;  %v230_v7 = vld [vmem:[%s796_s2] sm:$0xff]  ;;  %v605_v8 = vmov 0   ;;  %v231_v11 = vld [vmem:[%s796_s2 + $0x8] sm:$0xff]  ;;  %v232_v14 = vld [vmem:[%s796_s2 + $0x10] sm:$0xff] }
   0xd   : > { %s503_s16 = sshll.u32 %s803_s12, 7  ;;  %578 = vset.pattern.permute.xlu0 %v605_v8  ;;  %579 = vset.pattern.permute.xlu1 %v605_v8  ;;  %v236_v15 = vld [vmem:[%s796_s2 + $0x30] sm:$0x3]  ;;  %v234_v17 = vld [vmem:[%s796_s2 + $0x20] sm:$0xff]  ;;  %v233_v19 = vld [vmem:[%s796_s2 + $0x18] sm:$0xff]  ;;  %s552_s25 = smul.u32 56, %s803_s12 }
   0xe   : > { %s650_s19 = scalar_lea.vmem %s794_s0, %s503_s16  ;;  %239 = vperm.xlu0 %578, %v230_v7   ;;  %580 = vset.pattern.permute.xlu2 %v605_v8  ;;  %v235_v20 = vld [vmem:[%s796_s2 + $0x28] sm:$0xff]  ;;  %v223_v24 = vld [vmem:[%s795_s1] sm:$0xff]  ;;  %v226_v25 = vld [vmem:[%s795_s1 + $0x18] sm:$0xff] }
   0xf   : > { %v222_v0 = vld [vmem:[%s650_s19 + $0x78] sm:$0xff]  ;;  %v221_v1 = vld [vmem:[%s650_s19 + $0x70] sm:$0xff]  ;;  %v220_v2 = vld [vmem:[%s650_s19 + $0x68] sm:$0xff]  ;;  %249 = vperm.xlu1 %579, %v232_v14   ;;  %259 = vperm.xlu2 %580, %v234_v17   ;;  %s206_s28 = scalar_lea.vmem %s797_s3, %s552_s25 }
  0x10   : > { %478 = vmatpush.xpose.msk.msra.mxu0 %vm272_vm0, %v222_v0  ;;  %505 = vmatpush.xpose.msk.msra.mxu2 %vm272_vm0, %v222_v0  ;;  %v219_v3 = vld [vmem:[%s650_s19 + $0x60] sm:$0xff]  ;;  %v218_v4 = vld [vmem:[%s650_s19 + $0x58] sm:$0xff]  ;;  %v217_v5 = vld [vmem:[%s650_s19 + $0x50] sm:$0xff] }
  0x11   : > { %506 = vmatpush.xpose.msk.msra.mxu3 %vm272_vm0, %v222_v0  ;;  %504 = vmatpush.xpose.msk.msra.mxu1 %vm272_vm0, %v222_v0  ;;  %v216_v6 = vld [vmem:[%s650_s19 + $0x48] sm:$0xff]  ;;  %v215_v9 = vld [vmem:[%s650_s19 + $0x40] sm:$0xff]  ;;  %v214_v10 = vld [vmem:[%s650_s19 + $0x38] sm:$0xff] }
  0x12   : > { %v213_v12 = vld [vmem:[%s650_s19 + $0x30] sm:$0xff]  ;;  %v212_v13 = vld [vmem:[%s650_s19 + $0x28] sm:$0xff]  ;;  %v211_v16 = vld [vmem:[%s650_s19 + $0x20] sm:$0xff] }
  0x13   : > { %v210_v18 = vld [vmem:[%s650_s19 + $0x18] sm:$0xff]  ;;  %v209_v21 = vld [vmem:[%s650_s19 + $0x10] sm:$0xff]  ;;  %v208_v22 = vld [vmem:[%s650_s19 + $0x8] sm:$0xff] }
  0x14   : > { %479 = vmatpush.xpose.msk.msra.mxu0 %vm272_vm0, %v221_v1  ;;  %508 = vmatpush.xpose.msk.msra.mxu2 %vm272_vm0, %v221_v1  ;;  %v207_v23 = vld [vmem:[%s650_s19] sm:$0xff]  ;;  %v228_v26 = vld [vmem:[%s795_s1 + $0x28] sm:$0xff]  ;;  %v225_v27 = vld [vmem:[%s795_s1 + $0x10] sm:$0xff] }
  0x15   : > { %509 = vmatpush.xpose.msk.msra.mxu3 %vm272_vm0, %v221_v1  ;;  %507 = vmatpush.xpose.msk.msra.mxu1 %vm272_vm0, %v221_v1  ;;  %v224_v28 = vld [vmem:[%s795_s1 + $0x8] sm:$0xff]  ;;  %v227_v29 = vld [vmem:[%s795_s1 + $0x20] sm:$0xff]  ;;  %v229_v30 = vld [vmem:[%s795_s1 + $0x30] sm:$0x3] }
  0x16   : > { %244 = vperm.xlu0 %578, %v231_v11  }
  0x17   : > { %254 = vperm.xlu1 %579, %v233_v19   ;;  %264 = vperm.xlu2 %580, %v235_v20  }
  0x18   : > { %480 = vmatpush.xpose.msk.msra.mxu0 %vm272_vm0, %v220_v2  ;;  %511 = vmatpush.xpose.msk.msra.mxu2 %vm272_vm0, %v220_v2 }
  0x19   : > { %512 = vmatpush.xpose.msk.msra.mxu3 %vm272_vm0, %v220_v2  ;;  %510 = vmatpush.xpose.msk.msra.mxu1 %vm272_vm0, %v220_v2 }
  0x1c   : > { %481 = vmatpush.xpose.msk.msra.mxu0 %vm272_vm0, %v219_v3  ;;  %514 = vmatpush.xpose.msk.msra.mxu2 %vm272_vm0, %v219_v3 }
  0x1d   : > { %515 = vmatpush.xpose.msk.msra.mxu3 %vm272_vm0, %v219_v3  ;;  %513 = vmatpush.xpose.msk.msra.mxu1 %vm272_vm0, %v219_v3 }
  0x1e   : > { %269 = vperm.xlu0 %578, %v236_v15  }
  0x20   : > { %482 = vmatpush.xpose.msk.msra.mxu0 %vm272_vm0, %v218_v4  ;;  %517 = vmatpush.xpose.msk.msra.mxu2 %vm272_vm0, %v218_v4 }
  0x21   : > { %518 = vmatpush.xpose.msk.msra.mxu3 %vm272_vm0, %v218_v4  ;;  %516 = vmatpush.xpose.msk.msra.mxu1 %vm272_vm0, %v218_v4 }
  0x24   : > { %483 = vmatpush.xpose.msk.msra.mxu0 %vm272_vm0, %v217_v5  ;;  %520 = vmatpush.xpose.msk.msra.mxu2 %vm272_vm0, %v217_v5 }
  0x25   : > { %521 = vmatpush.xpose.msk.msra.mxu3 %vm272_vm0, %v217_v5  ;;  %519 = vmatpush.xpose.msk.msra.mxu1 %vm272_vm0, %v217_v5 }
  0x28   : > { %484 = vmatpush.xpose.msk.msra.mxu0 %vm272_vm0, %v216_v6  ;;  %523 = vmatpush.xpose.msk.msra.mxu2 %vm272_vm0, %v216_v6 }
  0x29   : > { %524 = vmatpush.xpose.msk.msra.mxu3 %vm272_vm0, %v216_v6  ;;  %522 = vmatpush.xpose.msk.msra.mxu1 %vm272_vm0, %v216_v6 }
  0x2c   : > { %485 = vmatpush.xpose.msk.msra.mxu0 %vm272_vm0, %v215_v9  ;;  %526 = vmatpush.xpose.msk.msra.mxu2 %vm272_vm0, %v215_v9 }
  0x2d   : > { %527 = vmatpush.xpose.msk.msra.mxu3 %vm272_vm0, %v215_v9  ;;  %525 = vmatpush.xpose.msk.msra.mxu1 %vm272_vm0, %v215_v9 }
  0x30   : > { %486 = vmatpush.xpose.msk.msra.mxu0 %vm272_vm0, %v214_v10  ;;  %529 = vmatpush.xpose.msk.msra.mxu2 %vm272_vm0, %v214_v10 }
  0x31   : > { %530 = vmatpush.xpose.msk.msra.mxu3 %vm272_vm0, %v214_v10  ;;  %528 = vmatpush.xpose.msk.msra.mxu1 %vm272_vm0, %v214_v10 }
  0x34   : > { %487 = vmatpush.xpose.msk.msra.mxu0 %vm272_vm0, %v213_v12  ;;  %532 = vmatpush.xpose.msk.msra.mxu2 %vm272_vm0, %v213_v12 }
  0x35   : > { %533 = vmatpush.xpose.msk.msra.mxu3 %vm272_vm0, %v213_v12  ;;  %531 = vmatpush.xpose.msk.msra.mxu1 %vm272_vm0, %v213_v12 }
  0x38   : > { %488 = vmatpush.xpose.msk.msra.mxu0 %vm272_vm0, %v212_v13  ;;  %535 = vmatpush.xpose.msk.msra.mxu2 %vm272_vm0, %v212_v13 }
  0x39   : > { %536 = vmatpush.xpose.msk.msra.mxu3 %vm272_vm0, %v212_v13  ;;  %534 = vmatpush.xpose.msk.msra.mxu1 %vm272_vm0, %v212_v13 }
  0x3c   : > { %489 = vmatpush.xpose.msk.msra.mxu0 %vm272_vm0, %v211_v16  ;;  %538 = vmatpush.xpose.msk.msra.mxu2 %vm272_vm0, %v211_v16 }
  0x3d   : > { %539 = vmatpush.xpose.msk.msra.mxu3 %vm272_vm0, %v211_v16  ;;  %537 = vmatpush.xpose.msk.msra.mxu1 %vm272_vm0, %v211_v16 }
  0x40   : > { %490 = vmatpush.xpose.msk.msra.mxu0 %vm272_vm0, %v210_v18  ;;  %541 = vmatpush.xpose.msk.msra.mxu2 %vm272_vm0, %v210_v18 }
  0x41   : > { %542 = vmatpush.xpose.msk.msra.mxu3 %vm272_vm0, %v210_v18  ;;  %540 = vmatpush.xpose.msk.msra.mxu1 %vm272_vm0, %v210_v18 }
  0x44   : > { %491 = vmatpush.xpose.msk.msra.mxu0 %vm272_vm0, %v209_v21  ;;  %544 = vmatpush.xpose.msk.msra.mxu2 %vm272_vm0, %v209_v21 }
  0x45   : > { %545 = vmatpush.xpose.msk.msra.mxu3 %vm272_vm0, %v209_v21  ;;  %543 = vmatpush.xpose.msk.msra.mxu1 %vm272_vm0, %v209_v21 }
  0x48   : > { %492 = vmatpush.xpose.msk.msra.mxu0 %vm272_vm0, %v208_v22  ;;  %547 = vmatpush.xpose.msk.msra.mxu2 %vm272_vm0, %v208_v22 }
  0x49   : > { %548 = vmatpush.xpose.msk.msra.mxu3 %vm272_vm0, %v208_v22  ;;  %546 = vmatpush.xpose.msk.msra.mxu1 %vm272_vm0, %v208_v22 }
  0x4c   : > { %493 = vmatpush.xpose.msk.msra.mxu0 %vm272_vm0, %v207_v23  ;;  %550 = vmatpush.xpose.msk.msra.mxu2 %vm272_vm0, %v207_v23 }
  0x4d   : > { %551 = vmatpush.xpose.msk.msra.mxu3 %vm272_vm0, %v207_v23  ;;  %549 = vmatpush.xpose.msk.msra.mxu1 %vm272_vm0, %v207_v23 }
  0x4f   : > { %494 = vmatmul.msk.f32.vlgmr.msra.gmra.mxu0 %vm272_vm0, %v223_v24  ;;  %497 = vmatmul.msk.f32.vlgmr.msra.gmra.mxu2 %vm272_vm0, %v226_v25 }
  0x50   : > { %499 = vmatmul.msk.f32.vlgmr.msra.gmra.mxu3 %vm272_vm0, %v228_v26  ;;  %496 = vmatmul.msk.f32.vlgmr.msra.gmra.mxu1 %vm272_vm0, %v225_v27 }
  0x57   : > { %495 = vmatmul.msk.f32.gmra.mxu0 %vm272_vm0, %v224_v28  ;;  %498 = vmatmul.msk.f32.gmra.mxu2 %vm272_vm0, %v227_v29 }
  0x58   : > { %500 = vmatmul.msk.f32.gmra.mxu3 %vm272_vm0, %v229_v30 }
  0x69   : > { %v260_v33 = vpop.permute.xlu2 %259 }
  0x71   : > { %v265_v40 = vpop.permute.xlu2 %264 }
  0x80   : > { %v240_v32 = vpop.permute.xlu0 %239 }
  0x81   : > { %v250_v31 = vpop.permute.xlu1 %249 }
  0x88   : > { %v245_v39 = vpop.permute.xlu0 %244 }
  0x89   : > { %v255_v38 = vpop.permute.xlu1 %254 }
  0x90   : > { %v270_v48 = vpop.permute.xlu0 %269 }
  0xcc   : > { %v359_v34 = vpop.f32.mrf.mxu0 }
  0xcd   : > { %v360_v35 = vadd.f32 %v359_v34, %v240_v32  ;;  %v365_v36 = vpop.f32.mrf.mxu1 }
  0xce   : > { %v366_v37 = vadd.f32 %v365_v36, %v250_v31 }
  0xcf   : > { %380 = vst [vmem:[%s206_s28] sm:$0xff] %v360_v35 }
  0xd0   : > { %382 = vst [vmem:[%s206_s28 + $0x10] sm:$0xff] %v366_v37 }
  0xd2   : > { %v368_v41 = vpop.f32.mrf.mxu2 }
  0xd3   : > { %v369_v42 = vadd.f32 %v368_v41, %v255_v38  ;;  %v374_v43 = vpop.f32.mrf.mxu3 }
  0xd4   : > { %v375_v44 = vadd.f32 %v374_v43, %v265_v40  ;;  %v362_v45 = vpop.f32.mrf.mxu0 }
  0xd5   : > { %383 = vst [vmem:[%s206_s28 + $0x18] sm:$0xff] %v369_v42  ;;  %v363_v46 = vadd.f32 %v362_v45, %v245_v39 }
  0xd6   : > { %385 = vst [vmem:[%s206_s28 + $0x28] sm:$0xff] %v375_v44 }
  0xd7   : > { %381 = vst [vmem:[%s206_s28 + $0x8] sm:$0xff] %v363_v46 }
  0xda   : > { %v371_v47 = vpop.f32.mrf.mxu2 }
  0xdb   : > { %v372_v49 = vadd.f32 %v371_v47, %v260_v33  ;;  %v377_v50 = vpop.f32.mrf.mxu3 }
  0xdc   : > { %v378_v51 = vadd.f32 %v377_v50, %v270_v48 }
  0xdd   : > { %384 = vst [vmem:[%s206_s28 + $0x20] sm:$0xff] %v372_v49 }
  0xde   : > { %386 = vst [vmem:[%s206_s28 + $0x30] sm:$0x3] %v378_v51 }
  0xdf PF: > { %s13_s14 = sadd.s32 1, %s603_s14   ;;  %s798_s12 = smov %s599_s13 }
  0xe0   : > { %p10_p5 = scmp.ge.s32.totalorder %s13_s14, 4   ;;  %s799_s13 = smov %s801_s15 }
  0xe2   :  { %12 = sbr.rel (!%p10_p5) target bundleno = 2 (0x2), region = 62 }

</bundles_post_ra>
